<compile_context>
chip_gen: v7x
topology: tpu7x:2x2x1
jax: 0.10.0
libtpu: 0.0.40
codegen_flags: <defaults>
</compile_context>

<pallas_src>
import jax
import jax.numpy as jnp
from jax.experimental import pallas as pl
from jax.experimental.pallas import tpu as pltpu


def _round_up(n, m):
    return ((n + m - 1) // m) * m


def mlp_kernel(x_ref, w1_ref, w2_ref, b2_ref, w3_ref, b3_ref, o_ref):
    """Batch-on-lanes MLP tile.

    x_ref : (8, TB)   bf16  input tile (feature 7 is the constant-1 bias column)
    w1_ref: (128, 8)  bf16  [w1 | b1]  (bias folded into last column)
    w2_ref: (64, 128) bf16   b2_ref: (64, 1) f32
    w3_ref: (8, 64)   bf16  (row 0 = w3, rows 1..7 zero)   b3_ref: (1, 1) f32
    o_ref : (1, TB)   f32   lane-dense output
    """
    x = x_ref[...]

    # layer 1 (+ folded bias): (128,8) @ (8,TB) on the MXU, f32 accumulation
    h1 = jnp.dot(w1_ref[...], x, preferred_element_type=jnp.float32)
    h1 = jnp.maximum(h1, 0.0)                                  # ReLU in f32 (VPU)

    # layer 2: (64,128) @ (128,TB)
    h2 = jnp.dot(w2_ref[...], h1.astype(jnp.bfloat16),
                 preferred_element_type=jnp.float32) + b2_ref[...]
    h2 = jnp.maximum(h2, 0.0)

    # layer 3 on the (mostly idle) MXU: (8,64) @ (64,TB); row 0 holds the result
    o3 = jnp.dot(w3_ref[...], h2.astype(jnp.bfloat16),
                 preferred_element_type=jnp.float32)
    o_ref[...] = (o3[0:1, :] + b3_ref[...]).astype(o_ref.dtype)


def mlp_forward(x, params, *, tile_b=8192):
    """x: (B, 7) float32, params in PyTorch (out,in) layout. Returns (B, 1) f32."""
    B, fin = x.shape
    assert fin == 7

    # Batch tile: multiple of 128 lanes, large enough to amortize grid-step
    # overhead, capped so VMEM temporaries stay well inside v7x's 64 MiB.
    tile_b = max(128, min(_round_up(int(tile_b), 128), 16384))
    b_pad128 = _round_up(B, 128)
    tile_b = min(tile_b, b_pad128)
    # v7x megacore: keep >= 2 grid steps when the batch allows, so both
    # TensorCores get work under dimension_semantics=("parallel",).
    if b_pad128 >= 2 * 128 and tile_b > b_pad128 // 2:
        tile_b = max(128, ((b_pad128 // 2) // 128) * 128)
    b_pad = _round_up(B, tile_b)

    # Fold b1 via a constant-1 feature column; cast to bf16 before the single
    # transpose so the relayout pass writes half the bytes.
    x_aug = jnp.concatenate([x, jnp.ones((B, 1), x.dtype)], axis=1)     # (B, 8)
    if b_pad != B:
        x_aug = jnp.pad(x_aug, ((0, b_pad - B), (0, 0)))
    xt = x_aug.astype(jnp.bfloat16).T                                    # (8, b_pad)

    w1a = jnp.concatenate([params["w1"], params["b1"][:, None]],
                          axis=1).astype(jnp.bfloat16)                   # (128, 8)
    w2 = params["w2"].astype(jnp.bfloat16)                               # (64, 128)
    b2 = params["b2"].reshape(-1, 1).astype(jnp.float32)                 # (64, 1)
    w3 = jnp.pad(params["w3"].reshape(1, -1),
                 ((0, 7), (0, 0))).astype(jnp.bfloat16)                  # (8, 64)
    b3 = params["b3"].reshape(1, 1).astype(jnp.float32)                  # (1, 1)

    grid = (b_pad // tile_b,)

    def resident(arr):
        # full-array block, same block every grid step -> stays in VMEM, no re-DMA
        return pl.BlockSpec(arr.shape, lambda i: (0,) * arr.ndim)

    # ~1.3 KiB of f32/bf16 temporaries per batch column; budget 2 KiB + slack.
    vmem_limit = int(min(48 << 20, max(32 << 20, 2048 * tile_b + (4 << 20))))

    out = pl.pallas_call(
        mlp_kernel,
        out_shape=jax.ShapeDtypeStruct((1, b_pad), jnp.float32),
        grid_spec=pltpu.PrefetchScalarGridSpec(
            num_scalar_prefetch=0,
            grid=grid,
            in_specs=[
                pl.BlockSpec((8, tile_b), lambda i: (0, i)),   # x tile, lane-dense
                resident(w1a),
                resident(w2), resident(b2),
                resident(w3), resident(b3),
            ],
            out_specs=pl.BlockSpec((1, tile_b), lambda i: (0, i)),
        ),
        compiler_params=pltpu.CompilerParams(
            dimension_semantics=("parallel",),
            vmem_limit_bytes=vmem_limit,
        ),
    )(xt, w1a, w2, b2, w3, b3)

    return out[:, :B].T   # (B, 1)


def init_params(key):
    """PyTorch-layout params: W is (out_features, in_features), b is (out_features,).
    Uniform(-1/sqrt(fan_in), +1/sqrt(fan_in)) like nn.Linear's default init."""
    ks = jax.random.split(key, 6)

    def lin(kw, kb, fan_in, fan_out):
        bound = 1.0 / jnp.sqrt(jnp.float32(fan_in))
        w = jax.random.uniform(kw, (fan_out, fan_in), jnp.float32, -bound, bound)
        b = jax.random.uniform(kb, (fan_out,), jnp.float32, -bound, bound)
        return w, b

    w1, b1 = lin(ks[0], ks[1], 7, 128)
    w2, b2 = lin(ks[2], ks[3], 128, 64)
    w3, b3 = lin(ks[4], ks[5], 64, 1)
    return {"w1": w1, "b1": b1, "w2": w2, "b2": b2, "w3": w3, "b3": b3}


def reference_forward_f32(x, p):
    """Pure-f32 JAX reference with the exact PyTorch module semantics."""
    h1 = jnp.maximum(x @ p["w1"].T + p["b1"], 0.0)
    h2 = jnp.maximum(h1 @ p["w2"].T + p["b2"], 0.0)
    return h2 @ p["w3"].T + p["b3"]


def reference_forward_kernel_numerics(x, p):
    """Reference emulating the kernel numerics: bf16 matmul operands (b1 folded
    into a bf16 w1 column), f32 accumulation, f32 elementwise."""
    ones = jnp.ones((x.shape[0], 1), x.dtype)
    x_aug = jnp.concatenate([x, ones], axis=1).astype(jnp.bfloat16)
    w1a = jnp.concatenate([p["w1"], p["b1"][:, None]], axis=1).astype(jnp.bfloat16)
    h1 = jnp.dot(x_aug, w1a.T, preferred_element_type=jnp.float32)
    h1 = jnp.maximum(h1, 0.0)
    h2 = jnp.dot(h1.astype(jnp.bfloat16), p["w2"].T.astype(jnp.bfloat16),
                 preferred_element_type=jnp.float32) + p["b2"]
    h2 = jnp.maximum(h2, 0.0)
    return jnp.dot(h2.astype(jnp.bfloat16), p["w3"].T.astype(jnp.bfloat16),
                   preferred_element_type=jnp.float32) + p["b3"]


if __name__ == "__main__":
    key = jax.random.PRNGKey(0)
    kx, kx2, kp = jax.random.split(key, 3)
    params = init_params(kp)

    # small shape consistent with the module: batch=8, features=7
    B = 8
    x = jax.random.normal(kx, (B, 7), dtype=jnp.float32)
    out = jax.block_until_ready(mlp_forward(x, params))
    assert out.shape == (B, 1)
    assert jnp.allclose(out, reference_forward_kernel_numerics(x, params),
                        atol=1e-2, rtol=1e-2), "mismatch vs kernel-numerics reference"
    assert jnp.allclose(out, reference_forward_f32(x, params),
                        atol=5e-2, rtol=5e-2), "mismatch vs f32 reference"

    # multi-step grid + ragged tail (batch not a multiple of the tile)
    B2 = 300
    x2 = jax.random.normal(kx2, (B2, 7), dtype=jnp.float32)
    out2 = jax.block_until_ready(mlp_forward(x2, params))
    assert out2.shape == (B2, 1)
    assert jnp.allclose(out2, reference_forward_kernel_numerics(x2, params),
                        atol=1e-2, rtol=1e-2), "mismatch on ragged batch"

    print("KERNEL_OK")
</pallas_src>

<mosaic_0001>
module attributes {stable_mosaic.version = 11 : i64} {
  func.func @mlp_kernel(%arg0: i32, %arg1: memref<8x128xbf16, #tpu.memory_space<vmem>>, %arg2: memref<128x8xbf16, #tpu.memory_space<vmem>>, %arg3: memref<64x128xbf16, #tpu.memory_space<vmem>>, %arg4: memref<64x1xf32, #tpu.memory_space<vmem>>, %arg5: memref<8x64xbf16, #tpu.memory_space<vmem>>, %arg6: memref<1x1xf32, #tpu.memory_space<vmem>>, %arg7: memref<1x128xf32, #tpu.memory_space<vmem>>) attributes {dimension_semantics = [#tpu.dimension_semantics<parallel>], iteration_bounds = array<i64: 1>, scalar_prefetch = 0 : i64, scratch_operands = 0 : i64, tpu.core_type = #tpu.core_type<tc>, window_params = [{transform_indices = @transform_0, window_bounds = array<i64: 8, 128>}, {pipeline_mode = #tpu.pipeline_mode<synchronous>, transform_indices = @transform_1, window_bounds = array<i64: 128, 8>}, {pipeline_mode = #tpu.pipeline_mode<synchronous>, transform_indices = @transform_2, window_bounds = array<i64: 64, 128>}, {pipeline_mode = #tpu.pipeline_mode<synchronous>, transform_indices = @transform_3, window_bounds = array<i64: 64, 1>}, {pipeline_mode = #tpu.pipeline_mode<synchronous>, transform_indices = @transform_4, window_bounds = array<i64: 8, 64>}, {pipeline_mode = #tpu.pipeline_mode<synchronous>, transform_indices = @transform_5, window_bounds = array<i64: 1, 1>}, {transform_indices = @transform_6, window_bounds = array<i64: 1, 128>}]} {
    %c0 = arith.constant 0 : index
    %c0_0 = arith.constant 0 : index
    %0 = vector.load %arg1[%c0, %c0_0] : memref<8x128xbf16, #tpu.memory_space<vmem>>, vector<8x128xbf16>
    %c0_1 = arith.constant 0 : index
    %c0_2 = arith.constant 0 : index
    %1 = vector.load %arg2[%c0_1, %c0_2] : memref<128x8xbf16, #tpu.memory_space<vmem>>, vector<128x8xbf16>
    %cst = arith.constant dense<0.000000e+00> : vector<128x128xf32>
    %2 = tpu.matmul %1, %0, %cst {dimension_numbers = #tpu.dot_dimension_numbers<[1], [0], [0], [1], [0, 0, 1, 1], [], []>} : vector<128x8xbf16>, vector<8x128xbf16>, vector<128x128xf32> -> vector<128x128xf32>
    %cst_3 = arith.constant 0.000000e+00 : f32
    %3 = vector.broadcast %cst_3 : f32 to vector<128x128xf32>
    %4 = arith.maximumf %2, %3 : vector<128x128xf32>
    %c0_4 = arith.constant 0 : index
    %c0_5 = arith.constant 0 : index
    %5 = vector.load %arg3[%c0_4, %c0_5] : memref<64x128xbf16, #tpu.memory_space<vmem>>, vector<64x128xbf16>
    %6 = arith.truncf %4 : vector<128x128xf32> to vector<128x128xbf16>
    %cst_6 = arith.constant dense<0.000000e+00> : vector<64x128xf32>
    %7 = tpu.matmul %5, %6, %cst_6 {dimension_numbers = #tpu.dot_dimension_numbers<[1], [0], [0], [1], [0, 0, 1, 1], [], []>} : vector<64x128xbf16>, vector<128x128xbf16>, vector<64x128xf32> -> vector<64x128xf32>
    %c0_7 = arith.constant 0 : index
    %c0_8 = arith.constant 0 : index
    %8 = vector.load %arg4[%c0_7, %c0_8] : memref<64x1xf32, #tpu.memory_space<vmem>>, vector<64x1xf32>
    %9 = vector.broadcast %8 : vector<64x1xf32> to vector<64x128xf32>
    %10 = arith.addf %7, %9 : vector<64x128xf32>
    %cst_9 = arith.constant 0.000000e+00 : f32
    %11 = vector.broadcast %cst_9 : f32 to vector<64x128xf32>
    %12 = arith.maximumf %10, %11 : vector<64x128xf32>
    %c0_10 = arith.constant 0 : index
    %c0_11 = arith.constant 0 : index
    %13 = vector.load %arg5[%c0_10, %c0_11] : memref<8x64xbf16, #tpu.memory_space<vmem>>, vector<8x64xbf16>
    %14 = arith.truncf %12 : vector<64x128xf32> to vector<64x128xbf16>
    %cst_12 = arith.constant dense<0.000000e+00> : vector<8x128xf32>
    %15 = tpu.matmul %13, %14, %cst_12 {dimension_numbers = #tpu.dot_dimension_numbers<[1], [0], [0], [1], [0, 0, 1, 1], [], []>} : vector<8x64xbf16>, vector<64x128xbf16>, vector<8x128xf32> -> vector<8x128xf32>
    %16 = vector.extract_strided_slice %15 {offsets = [0, 0], sizes = [1, 128], strides = [1, 1]} : vector<8x128xf32> to vector<1x128xf32>
    %c0_13 = arith.constant 0 : index
    %c0_14 = arith.constant 0 : index
    %17 = vector.load %arg6[%c0_13, %c0_14] : memref<1x1xf32, #tpu.memory_space<vmem>>, vector<1x1xf32>
    %18 = vector.broadcast %17 : vector<1x1xf32> to vector<1x128xf32>
    %19 = arith.addf %16, %18 : vector<1x128xf32>
    %c0_15 = arith.constant 0 : index
    %c0_16 = arith.constant 0 : index
    %20 = vector.load %arg7[%c0_15, %c0_16] : memref<1x128xf32, #tpu.memory_space<vmem>>, vector<1x128xf32>
    tpu.vector_store %arg7[%c0_15, %c0_16], %19 {strides = array<i32>} : memref<1x128xf32, #tpu.memory_space<vmem>>, vector<1x128xf32>,
    return
  }
  func.func @transform_0(%arg0: i32) -> (i32, i32) {
    %c0_i32 = arith.constant 0 : i32
    %c0_i32_0 = arith.constant 0 : i32
    return %c0_i32, %arg0 : i32, i32
  }
  func.func @transform_1(%arg0: i32) -> (i32, i32) {
    %c0_i32 = arith.constant 0 : i32
    %c0_i32_0 = arith.constant 0 : i32
    %c0_i32_1 = arith.constant 0 : i32
    return %c0_i32, %c0_i32_0 : i32, i32
  }
  func.func @transform_2(%arg0: i32) -> (i32, i32) {
    %c0_i32 = arith.constant 0 : i32
    %c0_i32_0 = arith.constant 0 : i32
    %c0_i32_1 = arith.constant 0 : i32
    return %c0_i32, %c0_i32_0 : i32, i32
  }
  func.func @transform_3(%arg0: i32) -> (i32, i32) {
    %c0_i32 = arith.constant 0 : i32
    %c0_i32_0 = arith.constant 0 : i32
    %c0_i32_1 = arith.constant 0 : i32
    return %c0_i32, %c0_i32_0 : i32, i32
  }
  func.func @transform_4(%arg0: i32) -> (i32, i32) {
    %c0_i32 = arith.constant 0 : i32
    %c0_i32_0 = arith.constant 0 : i32
    %c0_i32_1 = arith.constant 0 : i32
    return %c0_i32, %c0_i32_0 : i32, i32
  }
  func.func @transform_5(%arg0: i32) -> (i32, i32) {
    %c0_i32 = arith.constant 0 : i32
    %c0_i32_0 = arith.constant 0 : i32
    %c0_i32_1 = arith.constant 0 : i32
    return %c0_i32, %c0_i32_0 : i32, i32
  }
  func.func @transform_6(%arg0: i32) -> (i32, i32) {
    %c0_i32 = arith.constant 0 : i32
    %c0_i32_0 = arith.constant 0 : i32
    return %c0_i32, %arg0 : i32, i32
  }
}

</mosaic_0001>

<bundles_post_ra>
// kernel: tpu_custom_call.1
= control target key start
LH: loop header
LB: loop body
LE: loop exit
PB: predicated region body
PF: predicated region fallthrough
CT: control target
= control target key end

     0   :  { %s734_s0 = inlined_call_operand.vmem [shape: bf16[8,128], index: 0, kind: input, shape index: {}]   ;;  %s735_s1 = inlined_call_operand.vmem [shape: bf16[128,8], index: 1, kind: input, shape index: {}]   ;;  %s736_s2 = inlined_call_operand.vmem [shape: bf16[64,128], index: 2, kind: input, shape index: {}]   ;;  %s737_s3 = inlined_call_operand.vmem [shape: f32[64,1], index: 3, kind: input, shape index: {}]   ;;  %s738_s4 = inlined_call_operand.vmem [shape: bf16[8,64], index: 4, kind: input, shape index: {}]   ;;  %s739_s5 = inlined_call_operand.<no memory space> [shape: f32[1,1], index: 5, kind: input, shape index: {}]   ;;  %s740_s6 = inlined_call_operand.hbm [shape: f32[1,128], index: 6, kind: output, shape index: {}]  }
   0x1   :  { %v11_v0 = vstv %s739_s5 }
   0x2   :  { %12 = vst [vmem:[#allocation2] sm:$0x1] %v11_v0 }
   0x3   :  { %v27_v1 = vld [vmem:[%s734_s0] sm:$0xf]  ;;  %vm109_vm0 = vcmask 1043456   ;;  %vm84_vm1 = vcmask 64512   ;;  %v571_v4 = vld [vmem:[%s735_s1 + $0x8] sm:$0xff]   ;;  %v572_v5 = vld [vmem:[%s735_s1 + $0x10] sm:$0xff]  }
   0x4   :  { %v570_v2 = vld [vmem:[%s735_s1] sm:$0xff]   ;;  %563 = vmatprep.subr.msk.bf16.mxu0 %vm109_vm0, %v27_v1  ;;  %v111_v3 = vsel %vm109_vm0, %v27_v1, 0  ;;  %v573_v6 = vld [vmem:[%s735_s1 + $0x18] sm:$0xff]  }
   0x5   :  { %510 = vmatpush3.bf16.msra.mxu0 %v111_v3  ;;  %511 = vmatprep.mubr.msk.bf16.mxu0 %vm84_vm1, %v570_v2  ;;  %v574_v7 = vld [vmem:[%s735_s1 + $0x20] sm:$0xff]  }
   0x8   :  { %512 = vmatmul.mubr.msk.bf16.vlgmr.msra.gmra.mrb[0].mxu0 %vm84_vm1, %v571_v4 }
   0x9   :  { %515 = vmatprep.mubr.msk.bf16.mxu0 %vm84_vm1, %v572_v5 }
   0xa   :  { %13 = vsyncpa [#allocation4], 0  ;;  %v575_v8 = vld [vmem:[%s735_s1 + $0x28] sm:$0xff]   ;;  %v576_v9 = vld [vmem:[%s735_s1 + $0x30] sm:$0xff]   ;;  %v606_v13 = vmov 0   ;;  %v607_v1 = vmov 0.0  }
   0xb   :  { %v577_v10 = vld [vmem:[%s735_s1 + $0x38] sm:$0xff]   ;;  %v578_v11 = vld [vmem:[%s736_s2] sm:$0xff]   ;;  %568 = vset.pattern.permute.xlu0 %v606_v13  ;;  %569 = vset.pattern.permute.xlu1 %v606_v13  ;;  %v244_v14 = vld [vmem:[%s737_s3 + $0x10] sm:$0xff]  ;;  %vm608_vm2 = vmmov 0   ;;  %vm392_vm3 = vcmask 523264   ;;  %s609_s12 = smov [#allocation3]  }
   0xc   :  { %543 = vmatprep.mubr.bf16.mxu1 %v578_v11  ;;  %v242_v12 = vld [vmem:[%s737_s3] sm:$0xff]  ;;  %262 = vperm.xlu1 %569, %v244_v14   ;;  %v243_v15 = vld [vmem:[%s737_s3 + $0x8] sm:$0xff]  ;;  %v245_v16 = vld [vmem:[%s737_s3 + $0x18] sm:$0xff]  ;;  %s454_s13 = sshll.u32 %s609_s12, 4  ;;  %s455_s13 = int_to_ptr.vmem [resolvable:$true] %s454_s13 }
   0xd   :  { %252 = vperm.xlu0 %568, %v242_v12   ;;  %v246_v17 = vld [vmem:[%s737_s3 + $0x20] sm:$0xff]  ;;  %v247_v18 = vld [vmem:[%s737_s3 + $0x28] sm:$0xff]  ;;  %v248_v19 = vld [vmem:[%s737_s3 + $0x30] sm:$0xff]  ;;  %551 = vmatprep.subr.bf16.mxu0 %v607_v1  ;;  %s582_s14 = scalar_lea.vmem %s455_s13, 16  ;;  %s586_s15 = scalar_lea.vmem %s455_s13, 32 }
   0xe   :  { %v249_v20 = vld [vmem:[%s737_s3 + $0x38] sm:$0xff]  ;;  %v436_v21 = vld [vmem:[#allocation2] sm:$0x1]  ;;  %v579_v62 = vld [vmem:[%s736_s2 + $0x8] sm:$0xff]   ;;  %p583_p0 = scmp.ne.s32.totalorder %s455_s13, %s582_s14  ;;  %p587_p1 = scmp.lt.s32.totalorder %s455_s13, %s455_s13 }
   0xf   :  { %v580_v63 = vld [vmem:[%s736_s2 + $0x10] sm:$0xff]   ;;  %v581_v0 = vld [vmem:[%s736_s2 + $0x18] sm:$0xff]   ;;  %p588_p2 = scmp.lt.s32.totalorder %s586_s15, %s582_s14 }
  0x10   :  { %516 = vmatmul.mubr.msk.bf16.gmra.mrb[4].mxu0 %vm84_vm1, %v573_v6  ;;  %267 = vperm.xlu1 %569, %v245_v16  }
  0x11   :  { %519 = vmatprep.mubr.msk.bf16.mxu0 %vm84_vm1, %v574_v7  ;;  %257 = vperm.xlu0 %568, %v243_v15   ;;  %p589_p3 = por %p588_p2, %p587_p1 }
  0x13   :  { %p590_p4 = pnand %p589_p3, %p583_p0 }
  0x14   :  { %277 = vperm.xlu1 %569, %v247_v18  }
  0x15   :  { %272 = vperm.xlu0 %568, %v246_v17  }
  0x18   :  { %520 = vmatmul.mubr.msk.bf16.gmra.mrb[8].mxu0 %vm84_vm1, %v575_v8  ;;  %287 = vperm.xlu1 %569, %v249_v20  }
  0x19   :  { %523 = vmatprep.mubr.msk.bf16.mxu0 %vm84_vm1, %v576_v9  ;;  %282 = vperm.xlu0 %568, %v248_v19  }
  0x1d   :  { %439 = vperm.xlu0 %568, %v436_v21  }
  0x20   :  { %524 = vmatmul.mubr.msk.bf16.gmra.mrb[12].mxu0 %vm84_vm1, %v577_v10 }
  0x21   :  { %559 = vmatprep.mubr.msk.bf16.mxu0 %vm608_vm2, %v607_v1 }
  0x8b   :  { %v263_v3 = vpop.permute.xlu1 %262 }
  0x8c   :  { %v253_v2 = vpop.permute.xlu0 %252 }
  0x8f   :  { %v268_v5 = vpop.permute.xlu1 %267 }
  0x90   :  { %v258_v4 = vpop.permute.xlu0 %257 }
  0x93   :  { %v278_v14 = vpop.permute.xlu1 %277 }
  0x94   :  { %v273_v9 = vpop.permute.xlu0 %272 }
  0x98   :  { %v283_v21 = vpop.permute.xlu0 %282 }
  0xdb   :  { %v513_v22 = vpop.f32.mrb[0].mxu0 }
  0xdc   :  { %v147_v23 = vpop.f32.mrb[1].mxu0  ;;  %v212_v25 = vmax.f32 %v513_v22, 0.0 }
  0xdd   :  { %v514_v24 = vpop.f32.mrb[2].mxu0  ;;  %v210_v28 = vmax.f32 %v147_v23, 0.0 }
  0xde   :  { %v213_v26 = vmax.f32 %v514_v24, 0.0  ;;  %v150_v27 = vpop.f32.mrb[3].mxu0 }
  0xdf   :  { %v211_v29 = vmax.f32 %v150_v27, 0.0 }
  0xe0   :  { %v235_v30 = vpack.c.bf16 %v213_v26, %v212_v25  ;;  %v288_v26 = vpop.permute.xlu1 %287 }
  0xe1   :  { %v234_v31 = vpack.c.bf16 %v211_v29, %v210_v28 }
  0xe3   :  { %v517_v32 = vpop.f32.mrb[4].mxu0  ;;  %527 = vmatprep.subr.bf16.mxu1 %v234_v31 }
  0xe4   :  { %v163_v33 = vpop.f32.mrb[5].mxu0  ;;  %528 = vmatpush3.bf16.msra.mxu1 %v234_v31  ;;  %v216_v35 = vmax.f32 %v517_v32, 0.0 }
  0xe5   :  { %v518_v34 = vpop.f32.mrb[6].mxu0  ;;  %529 = vmatprep.subr.bf16.mxu1 %v235_v30  ;;  %v214_v38 = vmax.f32 %v163_v33, 0.0 }
  0xe6   :  { %v217_v36 = vmax.f32 %v518_v34, 0.0  ;;  %v166_v37 = vpop.f32.mrb[7].mxu0 }
  0xe7   :  { %v215_v39 = vmax.f32 %v166_v37, 0.0 }
  0xe8   :  { %v237_v40 = vpack.c.bf16 %v217_v36, %v216_v35  ;;  %530 = vmatpush3.bf16.msra.mxu1 %v235_v30 }
  0xe9   :  { %v236_v41 = vpack.c.bf16 %v215_v39, %v214_v38  ;;  %v387_v38 = vld [vmem:[%s738_s4] sm:$0xf]  ;;  %v442_v39 = vlaneseq }
  0xeb   :  { %v521_v42 = vpop.f32.mrb[8].mxu0  ;;  %531 = vmatprep.subr.bf16.mxu1 %v236_v41 }
  0xec   :  { %v179_v43 = vpop.f32.mrb[9].mxu0  ;;  %532 = vmatpush3.bf16.msra.mxu1 %v236_v41  ;;  %v220_v45 = vmax.f32 %v521_v42, 0.0  ;;  %v440_v42 = vpop.permute.xlu0 %439 }
  0xed   :  { %v522_v44 = vpop.f32.mrb[10].mxu0  ;;  %533 = vmatprep.subr.bf16.mxu1 %v237_v40  ;;  %v218_v48 = vmax.f32 %v179_v43, 0.0 }
  0xee   :  { %v221_v46 = vmax.f32 %v522_v44, 0.0  ;;  %v182_v47 = vpop.f32.mrb[11].mxu0 }
  0xef   :  { %v219_v49 = vmax.f32 %v182_v47, 0.0 }
  0xf0   :  { %v239_v50 = vpack.c.bf16 %v221_v46, %v220_v45  ;;  %534 = vmatpush3.bf16.msra.mxu1 %v237_v40  ;;  %v443_v40 = vshrl.u32 %v442_v39, 7 }
  0xf1   :  { %v238_v51 = vpack.c.bf16 %v219_v49, %v218_v48 }
  0xf2   :  { %v444_v41 = vsub.s32 0, %v443_v40 }
  0xf3   :  { %v525_v52 = vpop.f32.mrb[12].mxu0  ;;  %535 = vmatprep.subr.bf16.mxu1 %v238_v51 }
  0xf4   :  { %v195_v53 = vpop.f32.mrb[13].mxu0  ;;  %536 = vmatpush3.bf16.msra.mxu1 %v238_v51  ;;  %v224_v55 = vmax.f32 %v525_v52, 0.0  ;;  %v445_v43 = vrot.slane %v440_v42, %v444_v41 }
  0xf5   :  { %v526_v54 = vpop.f32.mrb[14].mxu0  ;;  %537 = vmatprep.subr.bf16.mxu1 %v239_v50  ;;  %v222_v58 = vmax.f32 %v195_v53, 0.0 }
  0xf6   :  { %v225_v56 = vmax.f32 %v526_v54, 0.0  ;;  %v198_v57 = vpop.f32.mrb[15].mxu0 }
  0xf7   :  { %v223_v59 = vmax.f32 %v198_v57, 0.0 }
  0xf8   :  { %v241_v60 = vpack.c.bf16 %v225_v56, %v224_v55  ;;  %538 = vmatpush3.bf16.msra.mxu1 %v239_v50 }
  0xf9   :  { %v240_v61 = vpack.c.bf16 %v223_v59, %v222_v58 }
  0xfb   :  { %539 = vmatprep.subr.bf16.mxu1 %v240_v61 }
  0xfc   :  { %540 = vmatpush3.bf16.msra.mxu1 %v240_v61 }
  0xfd   :  { %541 = vmatprep.subr.bf16.mxu1 %v241_v60 }
 0x100   :  { %542 = vmatpush3.bf16.msra.mxu1 %v241_v60 }
 0x103   :  { %544 = vmatmul.mubr.bf16.vlgmr.msra.gmra.mrb[0].mxu1 %v579_v62 }
 0x104   :  { %547 = vmatprep.mubr.bf16.mxu1 %v580_v63 }
 0x10b   :  { %548 = vmatmul.mubr.bf16.gmra.mrb[4].mxu1 %v581_v0 }
 0x1d6   :  { %v545_v6 = vpop.f32.mrb[0].mxu1 }
 0x1d7   :  { %v357_v7 = vadd.f32 %v545_v6, %v263_v3  ;;  %v348_v8 = vpop.f32.mrb[1].mxu1 }
 0x1d8   :  { %v349_v10 = vadd.f32 %v348_v8, %v253_v2  ;;  %v546_v11 = vpop.f32.mrb[2].mxu1 }
 0x1d9   :  { %v360_v12 = vadd.f32 %v546_v11, %v268_v5  ;;  %v351_v13 = vpop.f32.mrb[3].mxu1  ;;  %v381_v16 = vmax.f32 %v357_v7, 0.0 }
 0x1da   :  { %v352_v15 = vadd.f32 %v351_v13, %v258_v4  ;;  %v379_v18 = vmax.f32 %v349_v10, 0.0 }
 0x1db   :  { %v382_v17 = vmax.f32 %v360_v12, 0.0 }
 0x1dc   :  { %v380_v19 = vmax.f32 %v352_v15, 0.0 }
 0x1dd   :  { %v389_v20 = vpack.c.bf16 %v382_v17, %v381_v16 }
 0x1de   :  { %v388_v22 = vpack.c.bf16 %v380_v19, %v379_v18  ;;  %v549_v23 = vpop.f32.mrb[4].mxu1 }
 0x1df   :  { %v373_v24 = vadd.f32 %v549_v23, %v283_v21  ;;  %v364_v25 = vpop.f32.mrb[5].mxu1 }
 0x1e0   :  { %v365_v27 = vadd.f32 %v364_v25, %v273_v9  ;;  %v550_v28 = vpop.f32.mrb[6].mxu1  ;;  %552 = vmatpush3.bf16.msra.mxu0 %v388_v22 }
 0x1e1   :  { %v376_v29 = vadd.f32 %v550_v28, %v288_v26  ;;  %v367_v30 = vpop.f32.mrb[7].mxu1  ;;  %553 = vmatprep.subr.bf16.mxu0 %v607_v1  ;;  %v385_v32 = vmax.f32 %v373_v24, 0.0 }
 0x1e2   :  { %v368_v31 = vadd.f32 %v367_v30, %v278_v14  ;;  %v383_v34 = vmax.f32 %v365_v27, 0.0 }
 0x1e3   :  { %v386_v33 = vmax.f32 %v376_v29, 0.0 }
 0x1e4   :  { %v384_v35 = vmax.f32 %v368_v31, 0.0  ;;  %554 = vmatpush3.bf16.msra.mxu0 %v389_v20 }
 0x1e5   :  { %v391_v36 = vpack.c.bf16 %v386_v33, %v385_v32  ;;  %555 = vmatprep.subr.bf16.mxu0 %v607_v1 }
 0x1e6   :  { %v390_v37 = vpack.c.bf16 %v384_v35, %v383_v34 }
 0x1e8   :  { %556 = vmatpush3.bf16.msra.mxu0 %v390_v37 }
 0x1e9   :  { %557 = vmatprep.subr.bf16.mxu0 %v607_v1 }
 0x1ec   :  { %558 = vmatpush3.bf16.msra.mxu0 %v391_v36 }
 0x1ef   :  { %560 = vmatmul.mubr.msk.bf16.vlgmr.msra.gmra.mrb[16].mxu0 %vm392_vm3, %v387_v38 }
 0x2c2   :  { %v430_v44 = vpop.f32.mrb[16].mxu0 }
 0x2c3   :  { %v446_v45 = vadd.f32 %v445_v43, %v430_v44  ;;  %v561_v46 = vpop.f32.mrb[17].mxu0 }
 0x2c4   :  { %v433_v47 = vpop.f32.mrb[18].mxu0 }
 0x2c5   :  { %447 = vst [vmem:[#allocation3] sm:$0x1] %v446_v45  ;;  %v562_v48 = vpop.f32.mrb[19].mxu0 }
 0x2c6   :  { %593 = shalt.err (!%p590_p4)
}
 0x2c7   :  { %s594_s17 = scalar_lea.hbm %s740_s6, 16 }
 0x2c8   :  { %p595_p5 = scmp.ne.s32.totalorder %s740_s6, %s594_s17  ;;  %p598_p6 = scmp.lt.u32.totalorder %s594_s17, %s740_s6 }
 0x2ca   :  { %p600_p7 = pnand %p598_p6, %p595_p5 }
 0x2cc   :  { %603 = shalt.err (!%p600_p7)
}
 0x2cd   :  { %457 = dma.vmem_to_hbm [thread:$0]  %s455_s13, 16, %s740_s6, [#allocation4]  }
 0x2ce   :  { %604 = dma.done.wait [#allocation4], 16  }
 0x2cf   :  { %605 = vsyncadd [#allocation4], 4294967280 }
 0x2d0   :  { %461 = vsyncpa [#allocation4], 1 }

</bundles_post_ra>
